<compile_context>
chip_gen: v7x
topology: tpu7x:2x2x1
jax: 0.10.0
libtpu: 0.0.40
codegen_flags: <defaults>
</compile_context>

<pallas_src>
import functools
import math

import jax
import jax.numpy as jnp
import numpy as np
from jax import lax
from jax.experimental import pallas as pl
from jax.experimental.pallas import tpu as pltpu


def _sublane_multiple(dtype):
    """Minimum second-minor tile multiple for a dtype (f32->8, bf16->16, i8->32)."""
    return max(8, 32 // jnp.dtype(dtype).itemsize)


def _pick_tile(n, max_tile, multiple):
    """Largest tile <= max_tile that divides n and is a multiple of `multiple`.

    Falls back to the full dimension (always a legal block shape)."""
    if n <= max_tile:
        return n
    t = (min(max_tile, n) // multiple) * multiple
    while t >= multiple:
        if n % t == 0:
            return t
        t -= multiple
    return n


def _vmem_capacity_bytes():
    try:
        return int(pltpu.get_tpu_info().vmem_capacity_bytes)
    except Exception:
        return 64 * 1024 * 1024   # conservative (v7x per-TensorCore)


# --------------------------------------------------------------------------
# Stage 1: fused Q / K / V input projections (lane-dense (B, S, H) outputs),
# 1/sqrt(dk) folded into the Q projection.
# --------------------------------------------------------------------------
def _qkv_proj_kernel(q_ref, k_ref, v_ref, wq_ref, wk_ref, wv_ref,
                     qp_ref, kp_ref, vp_ref, *, q_scale):
    scale = jnp.float32(q_scale)
    qw = jnp.dot(q_ref[0], wq_ref[...], preferred_element_type=jnp.float32)
    qp_ref[0] = (qw * scale).astype(qp_ref.dtype)
    kp_ref[0] = jnp.dot(k_ref[0], wk_ref[...],
                        preferred_element_type=jnp.float32).astype(kp_ref.dtype)
    vp_ref[0] = jnp.dot(v_ref[0], wv_ref[...],
                        preferred_element_type=jnp.float32).astype(vp_ref.dtype)


# --------------------------------------------------------------------------
# Stage 2: flash-style attention (online softmax over the KV grid axis) with
# the output projection fused into the finalize step as ONE (tq,H)@(H,H)
# matmul.  Heads are static lane slices of the H-wide tiles.
# --------------------------------------------------------------------------
def _mha_flash_kernel(*refs, n_heads, head_dim, has_mask, causal, neg_fill):
    if has_mask:
        (q_ref, k_ref, v_ref, mask_ref, wo_ref, out_ref,
         m_scr, l_scr, acc_scr) = refs
    else:
        (q_ref, k_ref, v_ref, wo_ref, out_ref,
         m_scr, l_scr, acc_scr) = refs
        mask_ref = None

    qi = pl.program_id(1)
    ki = pl.program_id(2)
    nk = pl.num_programs(2)
    tq = q_ref.shape[1]
    tk = k_ref.shape[1]
    fill = jnp.float32(neg_fill)

    @pl.when(ki == 0)
    def _init():
        m_scr[...] = jnp.full(m_scr.shape, -jnp.inf, m_scr.dtype)
        l_scr[...] = jnp.zeros(l_scr.shape, l_scr.dtype)
        acc_scr[...] = jnp.zeros(acc_scr.shape, acc_scr.dtype)

    def _attend():
        q = q_ref[0]     # (tq, H), already scaled by 1/sqrt(head_dim)
        k = k_ref[0]     # (tk, H)
        v = v_ref[0]     # (tk, H)

        if has_mask:
            masked = mask_ref[0] != 0                        # (tq, tk) bool
        elif causal:
            q_idx = qi * tq + lax.broadcasted_iota(jnp.int32, (tq, tk), 0)
            k_idx = ki * tk + lax.broadcasted_iota(jnp.int32, (tq, tk), 1)
            masked = k_idx > q_idx
        else:
            masked = None

        # NOTE: static Python head loop keeps the lane offsets static (cheap
        # slices).  For very large n_heads, promote heads to a grid axis.
        for h in range(n_heads):
            lo = h * head_dim
            qh = q[:, lo:lo + head_dim]                      # (tq, d)
            kh = k[:, lo:lo + head_dim]                      # (tk, d)
            vh = v[:, lo:lo + head_dim]                      # (tk, d)

            # scores = Qh @ Kh^T (contract dim 1 of both -> no explicit .T)
            s = lax.dot_general(qh, kh, (((1,), (1,)), ((), ())),
                                preferred_element_type=jnp.float32)
            if masked is not None:
                s = jnp.where(masked, fill, s)

            m_prev = m_scr[h]                                # (tq, 1)
            m_new = jnp.maximum(m_prev, jnp.max(s, axis=-1, keepdims=True))
            alpha = jnp.exp(m_prev - m_new)
            p = jnp.exp(s - m_new)                           # (tq, tk)
            l_scr[h] = alpha * l_scr[h] + jnp.sum(p, axis=-1, keepdims=True)
            acc_scr[:, lo:lo + head_dim] = (
                alpha * acc_scr[:, lo:lo + head_dim]
                + jnp.dot(p.astype(vh.dtype), vh,
                          preferred_element_type=jnp.float32))
            m_scr[h] = m_new

    if causal and not has_mask:
        # KV tiles strictly above the diagonal contribute exp(fill - m) == 0
        # exactly in f32, so they can be skipped entirely.
        pl.when(ki * tk <= qi * tq + (tq - 1))(_attend)
    else:
        _attend()

    @pl.when(ki == nk - 1)
    def _finalize():
        # Per-head softmax normalization (once per query tile), then ONE
        # full-width output projection -- full MXU contraction depth.
        ctx_parts = []
        for h in range(n_heads):
            lo = h * head_dim
            inv = pl.reciprocal(l_scr[h], approx=False)      # (tq, 1)
            ctx_parts.append(acc_scr[:, lo:lo + head_dim] * inv)
        ctx = jnp.concatenate(ctx_parts, axis=-1)            # (tq, H)
        out_ref[0] = jnp.dot(ctx.astype(wo_ref.dtype), wo_ref[...],
                             preferred_element_type=jnp.float32
                             ).astype(out_ref.dtype)


# --------------------------------------------------------------------------
# Wrapper
# --------------------------------------------------------------------------
def multihead_pallas(Q, K, V, Wq, Wk, Wv, Wo, mask=None, *, n_splits,
                     causal=False, q_tile=512, kv_tile=512, row_tile=512,
                     kv_buffers=2, proj_dtype=None):
    """Pallas implementation of MultiHead.forward.

    Q, K, V : (B, S, H)
    Wq/Wk/Wv/Wo : (H, H) nn.Linear weights (PyTorch convention: y = x @ W.T)
    mask : optional (B, S, S); nonzero/True entries are masked out.
    causal : generate a causal mask in-kernel (no mask DMA) instead of `mask`.
    proj_dtype : dtype for the projected Q/K/V stream (e.g. jnp.bfloat16 to
        halve K/V HBM traffic); accumulation stays f32.
    """
    if mask is not None and causal:
        raise ValueError("pass either an explicit mask or causal=True, not both")

    B, S, H = Q.shape
    assert H % n_splits == 0
    d = H // n_splits
    scale = 1.0 / math.sqrt(d)

    in_dtype = Q.dtype
    p_dtype = jnp.dtype(proj_dtype) if proj_dtype is not None else jnp.dtype(in_dtype)
    in_isz = jnp.dtype(in_dtype).itemsize
    p_isz = p_dtype.itemsize
    w_isz = jnp.dtype(Wq.dtype).itemsize
    has_mask_dma = mask is not None

    vmem_cap = _vmem_capacity_bytes()
    budget = int(vmem_cap * 0.85)

    # ---- dtype-aware tile selection (auto-shrink to fit VMEM) --------------
    r_mult = _sublane_multiple(in_dtype)
    q_mult = _sublane_multiple(p_dtype)
    if has_mask_dma:
        q_mult = max(q_mult, _sublane_multiple(jnp.int8))     # mask sublane dim
    tk_mult = 128 if has_mask_dma else _sublane_multiple(p_dtype)

    def _stage1_bytes(tr_):
        return (6 * tr_ * H * in_isz          # Q/K/V input tiles (x2 buffers)
                + 6 * tr_ * H * p_isz         # projected output tiles
                + 3 * H * H * w_isz)          # resident weight slabs

    def _stage2_bytes(tq_, tk_):
        b = 2 * tq_ * H * p_isz                               # Q tile
        b += 2 * kv_buffers * tk_ * H * p_isz                 # K and V tiles
        if has_mask_dma:
            b += 2 * tq_ * tk_                                # int8 mask tile
        b += H * H * w_isz                                    # resident Wo^T
        b += 2 * tq_ * H * in_isz                             # output tile
        b += tq_ * H * 4                                      # acc scratch
        b += 2 * n_splits * tq_ * 128 * 4                     # m/l scratch (padded)
        return b

    rt = row_tile
    tr = _pick_tile(S, rt, r_mult)
    while _stage1_bytes(tr) > budget and rt > r_mult:
        rt = max(r_mult, rt // 2)
        tr = _pick_tile(S, rt, r_mult)

    qt, kt = q_tile, kv_tile
    tq = _pick_tile(S, qt, q_mult)
    tk = _pick_tile(S, kt, tk_mult)
    while _stage2_bytes(tq, tk) > budget and (qt > q_mult or kt > tk_mult):
        if qt >= kt and qt > q_mult:
            qt = max(q_mult, qt // 2)
        elif kt > tk_mult:
            kt = max(tk_mult, kt // 2)
        else:
            qt = max(q_mult, qt // 2)
        tq = _pick_tile(S, qt, q_mult)
        tk = _pick_tile(S, kt, tk_mult)

    nq, nk = S // tq, S // tk

    vmem1 = min(vmem_cap, max(32 << 20, int(_stage1_bytes(tr) * 1.5) + (4 << 20)))
    vmem2 = min(vmem_cap, max(32 << 20, int(_stage2_bytes(tq, tk) * 1.5) + (4 << 20)))

    # nn.Linear stores (out, in); pre-transpose so kernels compute x @ W.
    WqT = jnp.transpose(Wq)
    WkT = jnp.transpose(Wk)
    WvT = jnp.transpose(Wv)
    WoT = jnp.transpose(Wo)

    # ---- Stage 1: fused Q/K/V projections ----------------------------------
    proj_cost = pl.CostEstimate(
        flops=int(6 * B * S * H * H),
        transcendentals=0,
        bytes_accessed=int(3 * B * S * H * (in_isz + p_isz) + 3 * H * H * w_isz))

    row_spec = pl.BlockSpec((1, tr, H), lambda b, r: (b, r, 0))
    w_spec = pl.BlockSpec((H, H), lambda b, r: (0, 0),
                          pipeline_mode=pl.Buffered(1))

    QP, KP, VP = pl.pallas_call(
        functools.partial(_qkv_proj_kernel, q_scale=scale),
        out_shape=(jax.ShapeDtypeStruct((B, S, H), p_dtype),
                   jax.ShapeDtypeStruct((B, S, H), p_dtype),
                   jax.ShapeDtypeStruct((B, S, H), p_dtype)),
        grid_spec=pltpu.PrefetchScalarGridSpec(
            num_scalar_prefetch=0,
            grid=(B, S // tr),
            in_specs=[row_spec, row_spec, row_spec, w_spec, w_spec, w_spec],
            out_specs=(row_spec, row_spec, row_spec)),
        compiler_params=pltpu.CompilerParams(
            dimension_semantics=("parallel", "parallel"),
            vmem_limit_bytes=vmem1),
        cost_estimate=proj_cost,
    )(Q, K, V, WqT, WkT, WvT)

    # ---- Stage 2: flash attention + fused output projection ----------------
    in_specs = [
        pl.BlockSpec((1, tq, H), lambda b, qi, ki: (b, qi, 0)),
        pl.BlockSpec((1, tk, H), lambda b, qi, ki: (b, ki, 0),
                     pipeline_mode=pl.Buffered(kv_buffers)),
        pl.BlockSpec((1, tk, H), lambda b, qi, ki: (b, ki, 0),
                     pipeline_mode=pl.Buffered(kv_buffers)),
    ]
    inputs = [QP, KP, VP]
    if has_mask_dma:
        in_specs.append(
            pl.BlockSpec((1, tq, tk), lambda b, qi, ki: (b, qi, ki)))
        inputs.append(mask.astype(jnp.int8))     # int8, not int32: 4x less DMA
    in_specs.append(pl.BlockSpec((H, H), lambda b, qi, ki: (0, 0),
                                 pipeline_mode=pl.Buffered(1)))
    inputs.append(WoT)

    attn_cost = pl.CostEstimate(
        flops=int(4 * B * S * S * H + 2 * B * S * H * H),
        transcendentals=int(B * n_splits * S * S),
        bytes_accessed=int(B * S * H * (p_isz + in_isz)
                           + 2 * nq * B * S * H * p_isz    # K/V re-read per q tile
                           + (B * S * S if has_mask_dma else 0)
                           + H * H * w_isz))

    return pl.pallas_call(
        functools.partial(_mha_flash_kernel, n_heads=n_splits, head_dim=d,
                          has_mask=has_mask_dma, causal=causal,
                          neg_fill=float(-100000000.0 * scale)),
        out_shape=jax.ShapeDtypeStruct((B, S, H), in_dtype),
        grid_spec=pltpu.PrefetchScalarGridSpec(
            num_scalar_prefetch=0,
            grid=(B, nq, nk),
            in_specs=in_specs,
            out_specs=pl.BlockSpec((1, tq, H), lambda b, qi, ki: (b, qi, 0)),
            scratch_shapes=[
                pltpu.VMEM((n_splits, tq, 1), jnp.float32),  # running max
                pltpu.VMEM((n_splits, tq, 1), jnp.float32),  # running denom
                pltpu.VMEM((tq, H), jnp.float32),            # context slab
            ]),
        compiler_params=pltpu.CompilerParams(
            dimension_semantics=("parallel", "parallel", "arbitrary"),
            vmem_limit_bytes=vmem2),
        cost_estimate=attn_cost,
    )(*inputs)


# --------------------------------------------------------------------------
# Pure-JAX transcription of the PyTorch module, for verification.
# --------------------------------------------------------------------------
def multihead_reference(Q, K, V, Wq, Wk, Wv, Wo, mask=None, *, n_splits):
    B, S, H = Q.shape
    d = H // n_splits

    def proj(x, W):
        return jnp.einsum('bsh,oh->bso', x, W)

    QW, KW, VW = proj(Q, Wq), proj(K, Wk), proj(V, Wv)

    def split_cat(x):
        parts = [x[:, :, h * d:(h + 1) * d] for h in range(n_splits)]
        return jnp.concatenate(parts, axis=0)

    QWs, KWs, VWs = split_cat(QW), split_cat(KW), split_cat(VW)
    if mask is not None:
        mask_full = jnp.concatenate([mask for _ in range(n_splits)], axis=0)
    else:
        mask_full = None

    w = jnp.einsum('bqd,bkd->bqk', QWs, KWs)
    if mask_full is not None:
        w = jnp.where(mask_full, -100000000.0, w)
    w = jax.nn.softmax(w / math.sqrt(d), axis=-1)
    c = jnp.einsum('bqk,bkd->bqd', w, VWs)

    parts = [c[h * B:(h + 1) * B] for h in range(n_splits)]
    c = jnp.concatenate(parts, axis=-1)
    return jnp.einsum('bsh,oh->bso', c, Wo)


if __name__ == "__main__":
    def make_inputs(key, B, S, H):
        kq, kk, kv, kwq, kwk, kwv, kwo = jax.random.split(key, 7)
        Q = jax.random.normal(kq, (B, S, H), dtype=jnp.float32)
        K = jax.random.normal(kk, (B, S, H), dtype=jnp.float32)
        V = jax.random.normal(kv, (B, S, H), dtype=jnp.float32)
        s = 1.0 / math.sqrt(H)
        Wq = jax.random.uniform(kwq, (H, H), jnp.float32, -s, s)
        Wk = jax.random.uniform(kwk, (H, H), jnp.float32, -s, s)
        Wv = jax.random.uniform(kwv, (H, H), jnp.float32, -s, s)
        Wo = jax.random.uniform(kwo, (H, H), jnp.float32, -s, s)
        return Q, K, V, Wq, Wk, Wv, Wo

    def run_case(case_idx, B, S, H, n_splits, *, with_mask=False,
                 causal=False, rtol=1e-4, atol=1e-4, **kw):
        key = jax.random.fold_in(jax.random.PRNGKey(0), case_idx)
        Q, K, V, Wq, Wk, Wv, Wo = make_inputs(key, B, S, H)
        causal_mask = jnp.broadcast_to(
            jnp.triu(jnp.ones((S, S), dtype=bool), k=1), (B, S, S))
        mask_arg = causal_mask if with_mask else None
        ref_mask = causal_mask if (with_mask or causal) else None
        out = jax.block_until_ready(
            multihead_pallas(Q, K, V, Wq, Wk, Wv, Wo, mask=mask_arg,
                             causal=causal, n_splits=n_splits, **kw))
        ref = multihead_reference(Q, K, V, Wq, Wk, Wv, Wo, mask=ref_mask,
                                  n_splits=n_splits)
        np.testing.assert_allclose(np.asarray(out), np.asarray(ref),
                                   rtol=rtol, atol=atol)

    # 1) Small shape implied by the module (seq=8, hidden=32, 4 heads), with an
    #    explicit (arbitrary) mask -> int8 mask DMA path, single KV tile.
    run_case(0, B=2, S=8, H=32, n_splits=4, with_mask=True)
    # 2) mask=None path, tiny tiles forced so the multi-tile online-softmax
    #    path is exercised.
    run_case(1, B=2, S=16, H=32, n_splits=4, q_tile=8, kv_tile=8)
    # 3) Explicit mask + KV tiling (tk multiple of 128 with a DMA'd mask).
    run_case(2, B=2, S=256, H=32, n_splits=4, with_mask=True,
             q_tile=128, kv_tile=128)
    # 4) In-kernel causal mask generation + above-diagonal KV tile skipping.
    run_case(3, B=2, S=256, H=32, n_splits=4, causal=True,
             q_tile=128, kv_tile=128)
    # 5) bfloat16 projected Q/K/V stream (halves K/V HBM traffic); looser tol.
    run_case(4, B=2, S=64, H=32, n_splits=4, proj_dtype=jnp.bfloat16,
             rtol=5e-2, atol=5e-2)

    print("KERNEL_OK")
</pallas_src>

<mosaic_0001>
module attributes {stable_mosaic.version = 11 : i64} {
  func.func @_qkv_proj_kernel(%arg0: i32, %arg1: i32, %arg2: memref<1x8x32xf32, #tpu.memory_space<vmem>>, %arg3: memref<1x8x32xf32, #tpu.memory_space<vmem>>, %arg4: memref<1x8x32xf32, #tpu.memory_space<vmem>>, %arg5: memref<32x32xf32, #tpu.memory_space<vmem>>, %arg6: memref<32x32xf32, #tpu.memory_space<vmem>>, %arg7: memref<32x32xf32, #tpu.memory_space<vmem>>, %arg8: memref<1x8x32xf32, #tpu.memory_space<vmem>>, %arg9: memref<1x8x32xf32, #tpu.memory_space<vmem>>, %arg10: memref<1x8x32xf32, #tpu.memory_space<vmem>>) attributes {dimension_semantics = [#tpu.dimension_semantics<parallel>, #tpu.dimension_semantics<parallel>], iteration_bounds = array<i64: 2, 1>, scalar_prefetch = 0 : i64, scratch_operands = 0 : i64, tpu.core_type = #tpu.core_type<tc>, window_params = [{transform_indices = @transform_0, window_bounds = array<i64: 1, 8, 32>}, {transform_indices = @transform_1, window_bounds = array<i64: 1, 8, 32>}, {transform_indices = @transform_2, window_bounds = array<i64: 1, 8, 32>}, {pipeline_mode = #tpu.pipeline_mode<synchronous>, transform_indices = @transform_3, window_bounds = array<i64: 32, 32>}, {pipeline_mode = #tpu.pipeline_mode<synchronous>, transform_indices = @transform_4, window_bounds = array<i64: 32, 32>}, {pipeline_mode = #tpu.pipeline_mode<synchronous>, transform_indices = @transform_5, window_bounds = array<i64: 32, 32>}, {transform_indices = @transform_6, window_bounds = array<i64: 1, 8, 32>}, {transform_indices = @transform_7, window_bounds = array<i64: 1, 8, 32>}, {transform_indices = @transform_8, window_bounds = array<i64: 1, 8, 32>}]} {
    %c0 = arith.constant 0 : index
    %c0_0 = arith.constant 0 : index
    %c0_1 = arith.constant 0 : index
    %0 = vector.load %arg2[%c0, %c0_0, %c0_1] : memref<1x8x32xf32, #tpu.memory_space<vmem>>, vector<1x8x32xf32>
    %1 = vector.shape_cast %0 : vector<1x8x32xf32> to vector<8x32xf32>
    %c0_2 = arith.constant 0 : index
    %c0_3 = arith.constant 0 : index
    %2 = vector.load %arg5[%c0_2, %c0_3] : memref<32x32xf32, #tpu.memory_space<vmem>>, vector<32x32xf32>
    %cst = arith.constant dense<0.000000e+00> : vector<8x32xf32>
    %3 = tpu.matmul %1, %2, %cst {dimension_numbers = #tpu.dot_dimension_numbers<[1], [0], [0], [1], [0, 0, 1, 1], [], []>} : vector<8x32xf32>, vector<32x32xf32>, vector<8x32xf32> -> vector<8x32xf32>
    %cst_4 = arith.constant 0.353553385 : f32
    %4 = vector.broadcast %cst_4 : f32 to vector<8x32xf32>
    %5 = arith.mulf %3, %4 : vector<8x32xf32>
    %c0_5 = arith.constant 0 : index
    %c0_6 = arith.constant 0 : index
    %c0_7 = arith.constant 0 : index
    %6 = vector.load %arg8[%c0_5, %c0_6, %c0_7] : memref<1x8x32xf32, #tpu.memory_space<vmem>>, vector<1x8x32xf32>
    %7 = vector.shape_cast %6 : vector<1x8x32xf32> to vector<8x32xf32>
    %8 = vector.shape_cast %5 : vector<8x32xf32> to vector<1x8x32xf32>
    tpu.vector_store %arg8[%c0_5, %c0_6, %c0_7], %8 {strides = array<i32>} : memref<1x8x32xf32, #tpu.memory_space<vmem>>, vector<1x8x32xf32>,
    %c0_8 = arith.constant 0 : index
    %c0_9 = arith.constant 0 : index
    %c0_10 = arith.constant 0 : index
    %9 = vector.load %arg3[%c0_8, %c0_9, %c0_10] : memref<1x8x32xf32, #tpu.memory_space<vmem>>, vector<1x8x32xf32>
    %10 = vector.shape_cast %9 : vector<1x8x32xf32> to vector<8x32xf32>
    %c0_11 = arith.constant 0 : index
    %c0_12 = arith.constant 0 : index
    %11 = vector.load %arg6[%c0_11, %c0_12] : memref<32x32xf32, #tpu.memory_space<vmem>>, vector<32x32xf32>
    %cst_13 = arith.constant dense<0.000000e+00> : vector<8x32xf32>
    %12 = tpu.matmul %10, %11, %cst_13 {dimension_numbers = #tpu.dot_dimension_numbers<[1], [0], [0], [1], [0, 0, 1, 1], [], []>} : vector<8x32xf32>, vector<32x32xf32>, vector<8x32xf32> -> vector<8x32xf32>
    %c0_14 = arith.constant 0 : index
    %c0_15 = arith.constant 0 : index
    %c0_16 = arith.constant 0 : index
    %13 = vector.load %arg9[%c0_14, %c0_15, %c0_16] : memref<1x8x32xf32, #tpu.memory_space<vmem>>, vector<1x8x32xf32>
    %14 = vector.shape_cast %13 : vector<1x8x32xf32> to vector<8x32xf32>
    %15 = vector.shape_cast %12 : vector<8x32xf32> to vector<1x8x32xf32>
    tpu.vector_store %arg9[%c0_14, %c0_15, %c0_16], %15 {strides = array<i32>} : memref<1x8x32xf32, #tpu.memory_space<vmem>>, vector<1x8x32xf32>,
    %c0_17 = arith.constant 0 : index
    %c0_18 = arith.constant 0 : index
    %c0_19 = arith.constant 0 : index
    %16 = vector.load %arg4[%c0_17, %c0_18, %c0_19] : memref<1x8x32xf32, #tpu.memory_space<vmem>>, vector<1x8x32xf32>
    %17 = vector.shape_cast %16 : vector<1x8x32xf32> to vector<8x32xf32>
    %c0_20 = arith.constant 0 : index
    %c0_21 = arith.constant 0 : index
    %18 = vector.load %arg7[%c0_20, %c0_21] : memref<32x32xf32, #tpu.memory_space<vmem>>, vector<32x32xf32>
    %cst_22 = arith.constant dense<0.000000e+00> : vector<8x32xf32>
    %19 = tpu.matmul %17, %18, %cst_22 {dimension_numbers = #tpu.dot_dimension_numbers<[1], [0], [0], [1], [0, 0, 1, 1], [], []>} : vector<8x32xf32>, vector<32x32xf32>, vector<8x32xf32> -> vector<8x32xf32>
    %c0_23 = arith.constant 0 : index
    %c0_24 = arith.constant 0 : index
    %c0_25 = arith.constant 0 : index
    %20 = vector.load %arg10[%c0_23, %c0_24, %c0_25] : memref<1x8x32xf32, #tpu.memory_space<vmem>>, vector<1x8x32xf32>
    %21 = vector.shape_cast %20 : vector<1x8x32xf32> to vector<8x32xf32>
    %22 = vector.shape_cast %19 : vector<8x32xf32> to vector<1x8x32xf32>
    tpu.vector_store %arg10[%c0_23, %c0_24, %c0_25], %22 {strides = array<i32>} : memref<1x8x32xf32, #tpu.memory_space<vmem>>, vector<1x8x32xf32>,
    return
  }
  func.func @transform_0(%arg0: i32, %arg1: i32) -> (i32, i32, i32) {
    %c0_i32 = arith.constant 0 : i32
    %c0_i32_0 = arith.constant 0 : i32
    return %arg0, %arg1, %c0_i32 : i32, i32, i32
  }
  func.func @transform_1(%arg0: i32, %arg1: i32) -> (i32, i32, i32) {
    %c0_i32 = arith.constant 0 : i32
    %c0_i32_0 = arith.constant 0 : i32
    return %arg0, %arg1, %c0_i32 : i32, i32, i32
  }
  func.func @transform_2(%arg0: i32, %arg1: i32) -> (i32, i32, i32) {
    %c0_i32 = arith.constant 0 : i32
    %c0_i32_0 = arith.constant 0 : i32
    return %arg0, %arg1, %c0_i32 : i32, i32, i32
  }
  func.func @transform_3(%arg0: i32, %arg1: i32) -> (i32, i32) {
    %c0_i32 = arith.constant 0 : i32
    %c0_i32_0 = arith.constant 0 : i32
    %c0_i32_1 = arith.constant 0 : i32
    return %c0_i32, %c0_i32_0 : i32, i32
  }
  func.func @transform_4(%arg0: i32, %arg1: i32) -> (i32, i32) {
    %c0_i32 = arith.constant 0 : i32
    %c0_i32_0 = arith.constant 0 : i32
    %c0_i32_1 = arith.constant 0 : i32
    return %c0_i32, %c0_i32_0 : i32, i32
  }
  func.func @transform_5(%arg0: i32, %arg1: i32) -> (i32, i32) {
    %c0_i32 = arith.constant 0 : i32
    %c0_i32_0 = arith.constant 0 : i32
    %c0_i32_1 = arith.constant 0 : i32
    return %c0_i32, %c0_i32_0 : i32, i32
  }
  func.func @transform_6(%arg0: i32, %arg1: i32) -> (i32, i32, i32) {
    %c0_i32 = arith.constant 0 : i32
    %c0_i32_0 = arith.constant 0 : i32
    return %arg0, %arg1, %c0_i32 : i32, i32, i32
  }
  func.func @transform_7(%arg0: i32, %arg1: i32) -> (i32, i32, i32) {
    %c0_i32 = arith.constant 0 : i32
    %c0_i32_0 = arith.constant 0 : i32
    return %arg0, %arg1, %c0_i32 : i32, i32, i32
  }
  func.func @transform_8(%arg0: i32, %arg1: i32) -> (i32, i32, i32) {
    %c0_i32 = arith.constant 0 : i32
    %c0_i32_0 = arith.constant 0 : i32
    return %arg0, %arg1, %c0_i32 : i32, i32, i32
  }
}

</mosaic_0001>

<bundles_post_ra>
// kernel: tpu_custom_call.1
= control target key start
LH: loop header
LB: loop body
LE: loop exit
PB: predicated region body
PF: predicated region fallthrough
CT: control target
= control target key end

     0   :  { %s2038_s0 = inlined_call_operand.hbm [shape: f32[2,8,32], index: 0, kind: input, shape index: {}]   ;;  %s2039_s1 = inlined_call_operand.hbm [shape: f32[2,8,32], index: 1, kind: input, shape index: {}]   ;;  %s2040_s2 = inlined_call_operand.hbm [shape: f32[2,8,32], index: 2, kind: input, shape index: {}]   ;;  %s2041_s3 = inlined_call_operand.hbm [shape: f32[32,32], index: 3, kind: input, shape index: {}]   ;;  %s2042_s4 = inlined_call_operand.hbm [shape: f32[32,32], index: 4, kind: input, shape index: {}]   ;;  %s2043_s5 = inlined_call_operand.hbm [shape: f32[32,32], index: 5, kind: input, shape index: {}]   ;;  %s2044_s6 = inlined_call_operand.hbm [shape: f32[2,8,32], index: 6, kind: output, shape index: {0}]   ;;  %s2045_s7 = inlined_call_operand.hbm [shape: f32[2,8,32], index: 7, kind: output, shape index: {1}]   ;;  %s2046_s8 = inlined_call_operand.hbm [shape: f32[2,8,32], index: 8, kind: output, shape index: {2}]  }
   0x1   :  { %2076 = sst [smem:[#allocation30_spill]] %s2039_s1 }
   0x2   :  { %2077 = sst [smem:[#allocation31_spill]] %s2041_s3 }
   0x3   :  { %2078 = sst [smem:[#allocation32_spill]] %s2044_s6 }
   0x4   :  { %2079 = sst [smem:[#allocation33_spill]] %s2045_s7 }
   0x5   :  { %2080 = sst [smem:[#allocation34_spill]] %s2046_s8 }
   0x6   :  { %14 = vsyncpa [#allocation3], 0 }
   0x7   :  { %16 = vsyncpa [#allocation3 + $0x1], 0 }
   0x8   :  { %17 = vsyncpa [#allocation6], 0 }
   0x9   :  { %19 = vsyncpa [#allocation6 + $0x1], 0 }
   0xa   :  { %20 = vsyncpa [#allocation9], 0 }
   0xb   :  { %21 = vsyncpa [#allocation12], 0 }
   0xc   :  { %22 = vsyncpa [#allocation4], 0 }
   0xd   :  { %24 = vsyncpa [#allocation4 + $0x1], 0 }
   0xe   :  { %25 = vsyncpa [#allocation15], 0 }
   0xf   :  { %27 = vsyncpa [#allocation15 + $0x1], 0  ;;  %s1597_s27 = smov 0   ;;  %s1599_s28 = smov 0  }
  0x10   :  { %s1601_s29 = smov 0   ;;  %s1603_s30 = smov 0  }
  0x11   :  { %s1605_s9 = smov 0   ;;  %s1607_s10 = smov 0  }
  0x12 LB: > { %2081 = sst [smem:[#allocation23_spill]] %s1516_s27  ;;  %s1628_s11 = sadd.s32 4294967295, %s1536_s10   ;;  %s1536_s10 = sphi %s1607_s10, %s33_s10   ;;  %s1532_s9 = sphi %s1605_s9, %s2126_s9   ;;  %s1528_s30 = sphi %s1603_s30, %s2125_s30   ;;  %s1524_s29 = sphi %s1601_s29, %s2129_s29   ;;  %s1520_s28 = sphi %s1599_s28, %s2128_s28   ;;  %s1516_s27 = sphi %s1597_s27, %s2127_s27  }
  0x13   : > { %2082 = sst [smem:[#allocation24_spill]] %s1532_s9  ;;  %s2050_s12 = sadd.s32 4294967294, %s1536_s10  }
  0x14   : > { %2083 = sst [smem:[#allocation25_spill]] %s1536_s10  ;;  %p67_p0 = scmp.ne.s32.totalorder %s1520_s28, %s1516_s27 }
  0x15   : > { %p2047_p1 = scmp.eq.s32.totalorder %s1628_s11, 0  ;;  %p218_p3 = scmp.eq.s32.totalorder %s2050_s12, 1 }
  0x16   : > { %p992_p5 = scmp.ge.s32.totalorder %s1536_s10, 1  ;;  %p281_p7 = scmp.lt.s32.totalorder %s1536_s10, 3 }
  0x17   : > { %p1639_p4 = por %p2047_p1, %p67_p0  ;;  %p1644_p6 = por %p218_p3, %p67_p0 }
  0x18   : > { %p1649_p8 = pnand %p992_p5, %p281_p7  ;;  %s1538_s16 = smov [#allocation8]  }
  0x19   : > { %s2084_s13 = scalar_select %p1639_p4, 1, 0 }
  0x1a   : > { %s2085_s14 = scalar_select %p1644_p6, 1, 0 }
  0x1b   : > { %s2087_s15 = scalar_select %p1649_p8, 1, 0 }
  0x1c   : > { %2086 = sst [smem:[#allocation26_spill]] %s2085_s14  ;;  %s293_s17 = sshll.u32 %s1538_s16, 4  ;;  %s294_s17 = int_to_ptr.vmem [resolvable:$true] %s293_s17 }
  0x1d   : > { %p1114_p9 = pneg %p1649_p8  ;;  %s45_s19 = sadd.s32 1, %s1532_s9 }
  0x1e   : > { %s2089_s3 = sld [smem:[#allocation31_spill]] }
  0x1f   : > { %p1658_p11 = pnand %p1114_p9, %p2047_p1 }
  0x21   : > { %s2088_s18 = scalar_select %p1658_p11, 1, 0 }
  0x22   : > { %p1671_p13 = pneg %p1658_p11 }
  0x24   : > { %s1208_s22 = scalar_lea.hbm %s2089_s3, 512 }
  0x25   : > { %p1209_p12 = scmp.ne.s32.totalorder %s2089_s3, %s1208_s22  ;;  %p1215_p5 = scmp.lt.u32.totalorder %s1208_s22, %s2089_s3 }
  0x26   : > { %s2090_s25 = scalar_select %p1671_p13, 1, 0 }
  0x27   : > { %p1211_p0 = pnand %p1671_p13, %p1209_p12 }
  0x29   : > { %p1212_p3 = pneg %p1211_p0 }
  0x2b   : > { %p1217_p7 = pnand %p1215_p5, %p1212_p3 }
  0x2d   : > { %1220 = shalt.err (!%p1217_p7)
}
  0x2e   : > { %s1221_s20 = scalar_lea.vmem %s294_s17, 512  ;;  %p1229_p2 = scmp.lt.s32.totalorder %s294_s17, %s294_s17 }
  0x2f   : > { %p1222_p9 = scmp.ne.s32.totalorder %s294_s17, %s1221_s20  ;;  %p1230_p6 = scmp.lt.s32.totalorder %s1221_s20, %s1221_s20 }
  0x31   : > { %p1224_p10 = pnand %p1222_p9, %p1671_p13  ;;  %p1231_p4 = por %p1230_p6, %p1229_p2 }
  0x33   : > { %p1225_p1 = pneg %p1224_p10 }
  0x35   : > { %p1232_p8 = pnand %p1231_p4, %p1225_p1 }
  0x37   : > { %1235 = shalt.err (!%p1232_p8)
}
  0x38   : > { %s2051_s21 = smov 128   ;;  %s2053_s22 = smov 8  }
  0x39   : > { %1117 = dma.hbm_to_vmem [thread:$0]  (!%p1658_p11), %s2089_s3, 512, %s294_s17, [#allocation9], %s2051_s21, %s2051_s21, %s2053_s22  }
  0x3a   : > { %p47_p1 = scmp.ge.s32.totalorder %s45_s19, 2  ;;  %s54_s26 = sadd.s32 1, %s1524_s29 }
  0x3b   : > { %p61_p2 = scmp.ne.s32.totalorder %s1524_s29, %s1520_s28  ;;  %p62_p4 = scmp.eq.s32.totalorder %s1536_s10, 0 }
  0x3c   : > { %s2131_s19 = smov (%p47_p1, %s45_s19), 0  ;;  %p2092_p8 = scmp.eq.s32.totalorder %s1628_s11, 1 }
  0x3d   : > { %2091 = sst [smem:[#allocation27_spill]] %s2131_s19  ;;  %p63_p6 = por %p62_p4, %p61_p2 }
  0x3e   : > { %p1698_p10 = por %p2092_p8, %p61_p2  ;;  %s49_s20 = ssub.s32 %s1532_s9, %s2131_s19 }
  0x3f   : > { %p1147_p12 = scmp.lt.s32.totalorder %s1536_s10, 2  ;;  %p52_p0 = scmp.eq.s32.totalorder %s49_s20, 0 }
  0x40   : > { %s2093_s16 = scalar_select %p1698_p10, 1, 0 }
  0x41   : > { %s2056_s12 = sand.u32 1, %s1524_s29   ;;  %s1711_s23 = sshll.u32 %s1532_s9, 7 }
  0x42   : > { %2094 = sst [smem:[#allocation28_spill]] %s2093_s16  ;;  %s1708_s17 = sshll.u32 %s2056_s12, 3 }
  0x43   : > { %s1714_s24 = scalar_select %p52_p0, %s1524_s29, %s54_s26  }
  0x44   : > { %p1716_p3 = pnand %p1147_p12, %p63_p6  ;;  %s352_s22 = sand.u32 1, %s1536_s10  }
  0x45   : > { %2095 = sst [smem:[#allocation29_spill]] %s1714_s24  ;;  %s2097_s1 = sld [smem:[#allocation30_spill]] }
  0x46   : > { %s2096_s21 = scalar_select %p1716_p3, 1, 0 }
  0x47   : > { %s356_s12 = scalar_lea.vmem [#allocation5], %s1708_s17  ;;  %s1541_s26 = smov [#allocation10]  }
  0x48   : > { %s364_s9 = sshll.u32 %s356_s12, 4  ;;  %s1730_s24 = sshll.u32 %s1541_s26, 4  ;;  %s1728_s9 = int_to_ptr.vmem [resolvable:$true] %s364_s9  ;;  %s307_s24 = int_to_ptr.vmem [resolvable:$true] %s1730_s24 }
  0x49   : > { %s1732_s14 = scalar_lea.sflag [#allocation6], %s352_s22  ;;  %p1738_p7 = pneg %p1716_p3 }
  0x4b   : > { %s1725_s20 = scalar_lea.hbm %s2097_s1, %s1711_s23  ;;  %s1241_s10 = scalar_lea.hbm %s2097_s1, 256 }
  0x4c   : > { %s1236_s27 = scalar_lea.hbm %s1725_s20, 128  ;;  %p1242_p2 = scmp.lt.u32.totalorder %s1725_s20, %s2097_s1 }
  0x4d   : > { %p1237_p5 = scmp.ne.s32.totalorder %s1725_s20, %s1236_s27  ;;  %p1243_p4 = scmp.lt.u32.totalorder %s1241_s10, %s1236_s27 }
  0x4e   : > { %s2098_s3 = scalar_select %p1738_p7, 1, 0 }
  0x4f   : > { %p1239_p9 = pnand %p1738_p7, %p1237_p5  ;;  %p1244_p6 = por %p1243_p4, %p1242_p2 }
  0x50   : > { %p1245_p8 = scmp.lt.u32.totalorder %s1236_s27, %s1725_s20 }
  0x51   : > { %p1240_p1 = pneg %p1239_p9 }
  0x52   : > { %p1246_p12 = por %p1245_p8, %p1244_p6 }
  0x54   : > { %p1247_p0 = pnand %p1246_p12, %p1240_p1 }
  0x56   : > { %1250 = shalt.err (!%p1247_p0)
}
  0x57   : > { %s1251_s22 = scalar_lea.vmem %s1728_s9, 128  ;;  %s1542_s19 = smov [#allocation5]  }
  0x58   : > { %p1252_p5 = scmp.ne.s32.totalorder %s1728_s9, %s1251_s22  ;;  %s1256_s12 = sshll.u32 %s1542_s19, 4  ;;  %s1257_s12 = int_to_ptr.vmem [resolvable:$false] %s1256_s12 }
  0x59   : > { %s1258_s8 = scalar_lea.vmem %s1257_s12, 256  ;;  %p1259_p11 = scmp.lt.s32.totalorder %s1728_s9, %s1257_s12 }
  0x5a   : > { %p1254_p9 = pnand %p1252_p5, %p1738_p7  ;;  %p1260_p13 = scmp.lt.s32.totalorder %s1258_s8, %s1251_s22 }
  0x5c   : > { %p1255_p10 = pneg %p1254_p9  ;;  %p1261_p2 = por %p1260_p13, %p1259_p11 }
  0x5e   : > { %p1262_p4 = pnand %p1261_p2, %p1255_p10 }
  0x60   : > { %1265 = shalt.err (!%p1262_p4)
}
  0x61   : > { %1130 = dma.hbm_to_vmem [thread:$0]  (!%p1716_p3), %s1725_s20, 128, %s1728_s9, %s1732_s14  }
  0x62   : > { %s1266_s26 = scalar_lea.hbm %s2042_s4, 512  ;;  %p2099_p11 = scmp.ne.s32.totalorder %s2090_s25, 0 }
  0x63   : > { %p1267_p1 = scmp.ne.s32.totalorder %s2042_s4, %s1266_s26  ;;  %p1273_p6 = scmp.lt.u32.totalorder %s1266_s26, %s2042_s4 }
  0x65   : > { %p1269_p13 = pnand %p1267_p1, %p2099_p11 }
  0x67   : > { %p1270_p10 = pneg %p1269_p13 }
  0x69   : > { %p1275_p8 = pnand %p1273_p6, %p1270_p10 }
  0x6b   : > { %1278 = shalt.err (!%p1275_p8)
}
  0x6c   : > { %s1279_s8 = scalar_lea.vmem %s307_s24, 512  ;;  %p1287_p9 = scmp.lt.s32.totalorder %s307_s24, %s307_s24 }
  0x6d   : > { %p1280_p12 = scmp.ne.s32.totalorder %s307_s24, %s1279_s8  ;;  %p1288_p2 = scmp.lt.s32.totalorder %s1279_s8, %s1279_s8 }
  0x6f   : > { %p1282_p0 = pnand %p1280_p12, %p2099_p11  ;;  %p1289_p4 = por %p1288_p2, %p1287_p9 }
  0x71   : > { %p1283_p5 = pneg %p1282_p0 }
  0x73   : > { %p1290_p3 = pnand %p1289_p4, %p1283_p5 }
  0x75   : > { %1293 = shalt.err (!%p1290_p3)
}
  0x76   : > { %p2100_p1 = scmp.ne.s32.totalorder %s2088_s18, 0  ;;  %s2101_s1 = smov 8  }
  0x77   : > { %s2102_s9 = smov 128   ;;  %s1543_s10 = smov [#allocation11]  }
  0x78   : > { %1120 = dma.hbm_to_vmem [thread:$0]  (!%p2100_p1), %s2042_s4, 512, %s307_s24, [#allocation9], %s2102_s9, %s2102_s9, %s2101_s1  }
  0x79   : > { %s319_s26 = sshll.u32 %s1543_s10, 4  ;;  %s1294_s12 = scalar_lea.hbm %s2043_s5, 512  ;;  %s320_s26 = int_to_ptr.vmem [resolvable:$true] %s319_s26 }
  0x7a   : > { %p1295_p3 = scmp.ne.s32.totalorder %s2043_s5, %s1294_s12  ;;  %p1301_p6 = scmp.lt.u32.totalorder %s1294_s12, %s2043_s5 }
  0x7c   : > { %p1297_p13 = pnand %p1295_p3, %p2099_p11 }
  0x7e   : > { %p1298_p10 = pneg %p1297_p13 }
  0x80   : > { %p1303_p8 = pnand %p1301_p6, %p1298_p10 }
  0x82   : > { %1306 = shalt.err (!%p1303_p8)
}
  0x83   : > { %s1307_s24 = scalar_lea.vmem %s320_s26, 512  ;;  %p1315_p9 = scmp.lt.s32.totalorder %s320_s26, %s320_s26 }
  0x84   : > { %p1308_p12 = scmp.ne.s32.totalorder %s320_s26, %s1307_s24  ;;  %p1316_p2 = scmp.lt.s32.totalorder %s1307_s24, %s1307_s24 }
  0x86   : > { %p1310_p0 = pnand %p1308_p12, %p2099_p11  ;;  %p1317_p4 = por %p1316_p2, %p1315_p9 }
  0x88   : > { %p1311_p5 = pneg %p1310_p0 }
  0x8a   : > { %p1318_p7 = pnand %p1317_p4, %p1311_p5 }
  0x8c   : > { %1321 = shalt.err (!%p1318_p7)
}
  0x8d   : > { %1123 = dma.hbm_to_vmem [thread:$0]  (!%p2100_p1), %s2043_s5, 512, %s320_s26, [#allocation12], %s2102_s9, %s2102_s9, %s2101_s1  }
  0x8e   : > { %s1809_s20 = scalar_lea.hbm %s2038_s0, %s1711_s23  ;;  %s337_s18 = scalar_lea.vmem [#allocation2], %s1708_s17 }
  0x8f   : > { %s345_s27 = sshll.u32 %s337_s18, 4  ;;  %s2103_s10 = sand.u32 1, %s1524_s29   ;;  %s346_s27 = int_to_ptr.vmem [resolvable:$true] %s345_s27 }
  0x90   : > { %s334_s19 = scalar_lea.sflag [#allocation3], %s2103_s10  ;;  %s1322_s22 = scalar_lea.hbm %s1809_s20, 128 }
  0x91   : > { %p1323_p7 = scmp.ne.s32.totalorder %s1809_s20, %s1322_s22  ;;  %p2104_p11 = scmp.ne.s32.totalorder %s2098_s3, 0 }
  0x92   : > { %s1327_s26 = scalar_lea.hbm %s2038_s0, 256  ;;  %p1328_p1 = scmp.lt.u32.totalorder %s1809_s20, %s2038_s0 }
  0x93   : > { %p1325_p3 = pnand %p1323_p7, %p2104_p11  ;;  %p1329_p10 = scmp.lt.u32.totalorder %s1327_s26, %s1322_s22 }
  0x94   : > { %p1331_p8 = scmp.lt.u32.totalorder %s1322_s22, %s1809_s20 }
  0x95   : > { %p1326_p13 = pneg %p1325_p3  ;;  %p1330_p6 = por %p1329_p10, %p1328_p1 }
  0x97   : > { %p1332_p12 = por %p1331_p8, %p1330_p6 }
  0x99   : > { %p1333_p0 = pnand %p1332_p12, %p1326_p13 }
  0x9b   : > { %1336 = shalt.err (!%p1333_p0)
}
  0x9c   : > { %s1337_s24 = scalar_lea.vmem %s346_s27, 128  ;;  %s1544_s6 = smov [#allocation2]  }
  0x9d   : > { %p1338_p5 = scmp.ne.s32.totalorder %s346_s27, %s1337_s24  ;;  %s1342_s7 = sshll.u32 %s1544_s6, 4  ;;  %s1343_s7 = int_to_ptr.vmem [resolvable:$false] %s1342_s7 }
  0x9e   : > { %s1344_s25 = scalar_lea.vmem %s1343_s7, 256  ;;  %p1345_p4 = scmp.lt.s32.totalorder %s346_s27, %s1343_s7 }
  0x9f   : > { %p1340_p9 = pnand %p1338_p5, %p2104_p11  ;;  %p1346_p7 = scmp.lt.s32.totalorder %s1344_s25, %s1337_s24 }
  0xa1   : > { %p1341_p2 = pneg %p1340_p9  ;;  %p1347_p3 = por %p1346_p7, %p1345_p4 }
  0xa3   : > { %p1348_p1 = pnand %p1347_p3, %p1341_p2 }
  0xa5   : > { %1351 = shalt.err (!%p1348_p1)
}
  0xa6   : > { %p2105_p10 = scmp.ne.s32.totalorder %s2096_s21, 0  ;;  %s1835_s10 = scalar_lea.hbm %s2040_s2, %s1711_s23 }
  0xa7   : > { %s375_s22 = scalar_lea.vmem [#allocation7], %s1708_s17  ;;  %s1352_s9 = scalar_lea.hbm %s1835_s10, 128 }
  0xa8   : > { %1127 = dma.hbm_to_vmem [thread:$0]  (!%p2105_p10), %s1809_s20, 128, %s346_s27, %s334_s19  }
  0xa9   : > { %s383_s1 = sshll.u32 %s375_s22, 4  ;;  %p1353_p13 = scmp.ne.s32.totalorder %s1835_s10, %s1352_s9  ;;  %s384_s1 = int_to_ptr.vmem [resolvable:$true] %s383_s1 }
  0xaa   : > { %s1357_s20 = scalar_lea.hbm %s2040_s2, 256  ;;  %p1358_p12 = scmp.lt.u32.totalorder %s1835_s10, %s2040_s2 }
  0xab   : > { %p1355_p6 = pnand %p1353_p13, %p2104_p11  ;;  %p1359_p0 = scmp.lt.u32.totalorder %s1357_s20, %s1352_s9 }
  0xac   : > { %p1361_p9 = scmp.lt.u32.totalorder %s1352_s9, %s1835_s10 }
  0xad   : > { %p1356_p8 = pneg %p1355_p6  ;;  %p1360_p5 = por %p1359_p0, %p1358_p12 }
  0xaf   : > { %p1362_p2 = por %p1361_p9, %p1360_p5 }
  0xb1   : > { %p1363_p4 = pnand %p1362_p2, %p1356_p8 }
  0xb3   : > { %1366 = shalt.err (!%p1363_p4)
}
  0xb4   : > { %s1367_s17 = scalar_lea.vmem %s384_s1, 128  ;;  %s1545_s23 = smov [#allocation7]  }
  0xb5   : > { %p1368_p7 = scmp.ne.s32.totalorder %s384_s1, %s1367_s17  ;;  %s1372_s8 = sshll.u32 %s1545_s23, 4  ;;  %s1373_s8 = int_to_ptr.vmem [resolvable:$false] %s1372_s8 }
  0xb6   : > { %s1374_s24 = scalar_lea.vmem %s1373_s8, 256  ;;  %p1375_p13 = scmp.lt.s32.totalorder %s384_s1, %s1373_s8 }
  0xb7   : > { %p1370_p3 = pnand %p1368_p7, %p2104_p11  ;;  %p1376_p6 = scmp.lt.s32.totalorder %s1374_s24, %s1367_s17 }
  0xb9   : > { %p1371_p1 = pneg %p1370_p3  ;;  %p1377_p10 = por %p1376_p6, %p1375_p13 }
  0xbb   : > { %p1378_p0 = pnand %p1377_p10, %p1371_p1 }
  0xbd   : > { %1381 = shalt.err (!%p1378_p0)
}
  0xbe   : > { %p2106_p12 = scmp.ne.s32.totalorder %s2096_s21, 0  ;;  %p2107_p8 = scmp.ne.s32.totalorder %s2087_s15, 0 }
  0xbf   : > { %s1859_s3 = sand.u32 (!%p2107_p8), 1, %s1520_s28   ;;  %p2108_p11 = scmp.ne.s32.totalorder (!%p2107_p8), %s2084_s13, 0 }
  0xc0   : > { %1133 = dma.hbm_to_vmem [thread:$0]  (!%p2106_p12), %s1835_s10, 128, %s384_s1, %s1732_s14  }
  0xc1   : > { %392 = sbr.rel (%p2107_p8) target bundleno = 498 (0x1f2), region = 44  ;;  %s1862_s6 = sshll.u32 (!%p2107_p8), %s1859_s3, 3 }
  0xc2   : > { %s395_s7 = scalar_lea.sflag (!%p2107_p8), [#allocation3], %s1859_s3  ;;  %s398_s25 = scalar_lea.vmem (!%p2107_p8), [#allocation2], %s1862_s6 }
  0xc8   : > { %1491 = dma.done.wait (%p2108_p11), %s395_s7, 128  }
  0xc9   : > { %1493 = vsyncadd (%p2108_p11), %s395_s7, 4294967168  ;;  %s403_s14 = sand.u32 1, %s1628_s11   ;;  %s407_s21 = scalar_lea.vmem [#allocation5], %s1862_s6 }
  0xca   : > { %s404_s15 = scalar_lea.sflag [#allocation6], %s403_s14 }
  0xcb   : > { %1495 = dma.done.wait (%p2108_p11), %s404_s15, 256  }
  0xcc   : > { %1497 = vsyncadd (%p2108_p11), %s404_s15, 4294967040  ;;  %s416_s16 = scalar_lea.vmem [#allocation7], %s1862_s6  ;;  %p2109_p10 = scmp.eq.s32.totalorder %s1628_s11, 0 }
  0xce   : > { %1499 = dma.done.wait (%p2109_p10), [#allocation9], 1024   ;;  %p2110_p5 = pmov %p2109_p10 }
  0xd0   : > { %1501 = vsyncadd (%p2110_p5), [#allocation9], 4294966272  ;;  %p2111_p9 = pmov %p2110_p5 }
  0xd1   : > { %p2112_p2 = pmov %p2110_p5 }
  0xd2   : > { %1503 = dma.done.wait (%p2111_p9), [#allocation12], 512  }
  0xd3   : > { %1505 = vsyncadd (%p2112_p2), [#allocation12], 4294966784  ;;  %v1546_v0 = vmov 0.0|0.0   ;;  %vm1547_vm0 = vmmov 0   ;;  %v1548_v1 = vmov 0.0   ;;  %v482_v2 = vld [vmem:[#allocation8] sm:$0xff] }
  0xd4   : > { %1072 = vmatprep.subr.bf16.mxu0 %v1546_v0  ;;  %1078 = vmatprep.subr.bf16.mxu1 %v1546_v0  ;;  %v483_v3 = vld [vmem:[#allocation8 + $0x8] sm:$0xff]  ;;  %v484_v4 = vld [vmem:[#allocation8 + $0x10] sm:$0xff]  ;;  %v485_v6 = vld [vmem:[#allocation8 + $0x18] sm:$0xff]  ;;  %vm486_vm1 = vcmask 261120   ;;  %s1900_s13 = sshll.u32 %s1528_s30, 7  ;;  %s473_s18 = scalar_lea.vmem [#allocation14], %s1862_s6 }
  0xd5   : > { %1047 = vmatprep.mubr.msk.f32.mxu0 %vm1547_vm0, %v1548_v1  ;;  %1058 = vmatprep.mubr.msk.f32.mxu1 %vm1547_vm0, %v1548_v1  ;;  %v1073_v5 = vpack.c.bf16 %v483_v3, %v482_v2  ;;  %v563_v7 = vld [vmem:[#allocation10] sm:$0xff]  ;;  %v564_v8 = vld [vmem:[#allocation10 + $0x8] sm:$0xff]  ;;  %v1076_v10 = vpack.c.bf16 %v485_v6, %v484_v4  ;;  %v565_v11 = vld [vmem:[#allocation10 + $0x10] sm:$0xff]  ;;  %s759_s10 = sshll.u32 %s473_s18, 4  ;;  %s466_s22 = scalar_lea.vmem [#allocation13], %s1862_s6  ;;  %s1912_s10 = int_to_ptr.vmem [resolvable:$true] %s759_s10 }
  0xd6   : > { %v1079_v9 = vpack.c.bf16 %v564_v8, %v563_v7  ;;  %v566_v12 = vld [vmem:[#allocation10 + $0x18] sm:$0xff]  ;;  %v642_v13 = vld [vmem:[#allocation11] sm:$0xff]  ;;  %v643_v14 = vld [vmem:[#allocation11 + $0x8] sm:$0xff]  ;;  %s745_s1 = sshll.u32 %s466_s22, 4  ;;  %s2113_s12 = sld [smem:[#allocation33_spill]]  ;;  %s1920_s1 = int_to_ptr.vmem [resolvable:$true] %s745_s1 }
  0xd7   : > { %1074 = vmatpush3.bf16.msra.mxu0 %v1073_v5  ;;  %v1082_v15 = vpack.c.bf16 %v566_v12, %v565_v11  ;;  %v481_v16 = vld [vmem:[%s398_s25] sm:$0xff]  ;;  %v1085_v17 = vpack.c.bf16 %v643_v14, %v642_v13  ;;  %v562_v20 = vld [vmem:[%s407_s21] sm:$0xff]  ;;  %s2114_s20 = sld [smem:[#allocation28_spill]]  ;;  %s2115_s17 = sld [smem:[#allocation32_spill]] }
  0xd8   : > { %1075 = vmatprep.subr.bf16.mxu0 %v1546_v0  ;;  %1080 = vmatpush3.bf16.msra.mxu1 %v1079_v9  ;;  %v644_v18 = vld [vmem:[#allocation11 + $0x10] sm:$0xff]  ;;  %v645_v19 = vld [vmem:[#allocation11 + $0x18] sm:$0xff]  ;;  %s480_s8 = scalar_lea.vmem [#allocation16], %s1862_s6  ;;  %s1930_s7 = scalar_lea.sflag [#allocation15], %s403_s14 }
  0xd9   : > { %1081 = vmatprep.subr.bf16.mxu1 %v1546_v0  ;;  %v1088_v21 = vpack.c.bf16 %v645_v19, %v644_v18  ;;  %v641_v22 = vld [vmem:[%s416_s16] sm:$0xff]  ;;  %s1926_s24 = sshll.u32 %s480_s8, 4  ;;  %s1382_s25 = scalar_lea.vmem %s1912_s10, 128  ;;  %s1986_s24 = int_to_ptr.vmem [resolvable:$true] %s1926_s24 }
  0xda   : > { %p1383_p4 = scmp.ne.s32.totalorder %s1912_s10, %s1382_s25  ;;  %s1549_s15 = smov [#allocation14]  }
  0xdb   : > { %1077 = vmatpush3.bf16.msra.mxu0 %v1076_v10  ;;  %s1386_s21 = sshll.u32 %s1549_s15, 4  ;;  %s1387_s21 = int_to_ptr.vmem [resolvable:$false] %s1386_s21 }
  0xdc   : > { %1084 = vmatprep.subr.bf16.mxu0 %v1546_v0  ;;  %1083 = vmatpush3.bf16.msra.mxu1 %v1082_v15  ;;  %s1910_s27 = scalar_lea.hbm %s2113_s12, %s1900_s13  ;;  %s1388_s16 = scalar_lea.vmem %s1387_s21, 256 }
  0xdd   : > { %s1918_s23 = scalar_lea.hbm %s2115_s17, %s1900_s13  ;;  %p2116_p7 = scmp.ne.s32.totalorder %s2114_s20, 0 }
  0xde   : > { %1048 = vmatmul.mubr.msk.f32.vlgmr.msra.gmra.mrb[0].mxu0 %vm486_vm1, %v481_v16  ;;  %p1389_p13 = scmp.lt.s32.totalorder %s1912_s10, %s1387_s21  ;;  %p1390_p6 = scmp.lt.s32.totalorder %s1388_s16, %s1382_s25 }
  0xdf   : > { %1086 = vmatpush3.bf16.msra.mxu0 %v1085_v17  ;;  %1059 = vmatmul.mubr.msk.f32.vlgmr.msra.gmra.mrb[0].mxu1 %vm486_vm1, %v562_v20  ;;  %p1384_p3 = pnand %p1383_p4, %p2116_p7 }
  0xe0   : > { %1087 = vmatprep.subr.bf16.mxu0 %v1546_v0  ;;  %1069 = vmatprep.mubr.msk.f32.mxu0 %vm1547_vm0, %v1548_v1  ;;  %p1391_p0 = por %p1390_p6, %p1389_p13 }
  0xe1   : > { %p1385_p1 = pneg %p1384_p3 }
  0xe3   : > { %1089 = vmatpush3.bf16.msra.mxu0 %v1088_v21  ;;  %p1392_p12 = pnand %p1391_p0, %p1385_p1 }
  0xe6   : > { %1070 = vmatmul.mubr.msk.f32.vlgmr.msra.gmra.mrb[2].mxu0 %vm486_vm1, %v641_v22 }
 0x1b1   : > { %v556_v23 = vpop.f32.mrb[0].mxu0 }
 0x1b2   : > { %v560_v24 = vmul.f32 0.35355338, %v556_v23  ;;  %v1049_v25 = vpop.f32.mrb[1].mxu0  ;;  %v636_v26 = vpop.f32.mrb[0].mxu1 }
 0x1b3   : > { %640 = vst.msk [vmem:[%s473_s18] sm:$0xff] %vm486_vm1, %v636_v26  ;;  %v1060_v27 = vpop.f32.mrb[1].mxu1 }
 0x1b4   : > { %1395 = shalt.err (!%p1392_p12)
}
 0x1b5   : > { %s1396_s11 = scalar_lea.hbm %s1910_s27, 128  ;;  %s1400_s9 = scalar_lea.hbm %s2113_s12, 256 }
 0x1b6   : > { %p1397_p8 = scmp.ne.s32.totalorder %s1910_s27, %s1396_s11  ;;  %p1401_p5 = scmp.lt.u32.totalorder %s1910_s27, %s2113_s12 }
 0x1b7   : > { %p1402_p9 = scmp.lt.u32.totalorder %s1400_s9, %s1396_s11  ;;  %p1404_p4 = scmp.lt.u32.totalorder %s1396_s11, %s1910_s27 }
 0x1b8   : > { %p1398_p11 = pnand %p1397_p8, %p2116_p7 }
 0x1b9   : > { %p1403_p2 = por %p1402_p9, %p1401_p5 }
 0x1ba   : > { %p1399_p10 = pneg %p1398_p11 }
 0x1bb   : > { %p1405_p3 = por %p1404_p4, %p1403_p2 }
 0x1bd   : > { %p1406_p1 = pnand %p1405_p3, %p1399_p10 }
 0x1bf   : > { %1409 = shalt.err (!%p1406_p1)
}
 0x1c0   : > { %1109 = dma.vmem_to_hbm [thread:$0]  (%p2116_p7), %s1912_s10, 128, %s1910_s27, %s1930_s7   ;;  %561 = vst.msk [vmem:[%s466_s22] sm:$0xff] %vm486_vm1, %v560_v24 }
 0x1c1   : > { %s721_s19 = scalar_lea.sflag [#allocation4], %s1859_s3  ;;  %s1410_s25 = scalar_lea.vmem %s1920_s1, 128 }
 0x1c2   : > { %p1411_p13 = scmp.ne.s32.totalorder %s1920_s1, %s1410_s25  ;;  %s1550_s15 = smov [#allocation13]  }
 0x1c3   : > { %s1414_s21 = sshll.u32 %s1550_s15, 4  ;;  %s1415_s21 = int_to_ptr.vmem [resolvable:$false] %s1414_s21 }
 0x1c4   : > { %p1412_p6 = pnand %p1411_p13, %p2116_p7  ;;  %s1416_s16 = scalar_lea.vmem %s1415_s21, 256 }
 0x1c5   : > { %p1417_p12 = scmp.lt.s32.totalorder %s1920_s1, %s1415_s21  ;;  %p1418_p8 = scmp.lt.s32.totalorder %s1416_s16, %s1410_s25 }
 0x1c6   : > { %p1413_p0 = pneg %p1412_p6 }
 0x1c7   : > { %p1419_p11 = por %p1418_p8, %p1417_p12 }
 0x1c9   : > { %p1420_p10 = pnand %p1419_p11, %p1413_p0 }
 0x1cb   : > { %1423 = shalt.err (!%p1420_p10)
}
 0x1cc   : > { %s1424_s3 = scalar_lea.hbm %s1918_s23, 128  ;;  %s1428_s27 = scalar_lea.hbm %s2115_s17, 256 }
 0x1cd   : > { %p1425_p5 = scmp.ne.s32.totalorder %s1918_s23, %s1424_s3  ;;  %p1429_p4 = scmp.lt.u32.totalorder %s1918_s23, %s2115_s17 }
 0x1ce   : > { %p1430_p3 = scmp.lt.u32.totalorder %s1428_s27, %s1424_s3  ;;  %p1432_p13 = scmp.lt.u32.totalorder %s1424_s3, %s1918_s23 }
 0x1cf   : > { %p1426_p9 = pnand %p1425_p5, %p2116_p7 }
 0x1d0   : > { %p1431_p1 = por %p1430_p3, %p1429_p4 }
 0x1d1   : > { %p1427_p2 = pneg %p1426_p9 }
 0x1d2   : > { %p1433_p6 = por %p1432_p13, %p1431_p1 }
 0x1d4   : > { %p1434_p0 = pnand %p1433_p6, %p1427_p2 }
 0x1d6   : > { %1437 = shalt.err (!%p1434_p0)
}
 0x1d7   : > { %1108 = dma.vmem_to_hbm [thread:$0]  (%p2116_p7), %s1920_s1, 128, %s1918_s23, %s721_s19   ;;  %v715_v28 = vpop.f32.mrb[2].mxu0 }
 0x1d8   : > { %s2117_s26 = sld [smem:[#allocation34_spill]]  ;;  %719 = vst.msk [vmem:[%s480_s8] sm:$0xff] %vm486_vm1, %v715_v28  ;;  %v1071_v29 = vpop.f32.mrb[3].mxu0  ;;  %s1438_s25 = scalar_lea.vmem %s1986_s24, 128 }
 0x1d9   : > { %p1439_p12 = scmp.ne.s32.totalorder %s1986_s24, %s1438_s25  ;;  %s1551_s1 = smov [#allocation16]  }
 0x1da   : > { %s1442_s23 = sshll.u32 %s1551_s1, 4  ;;  %s1443_s23 = int_to_ptr.vmem [resolvable:$false] %s1442_s23 }
 0x1db   : > { %p1440_p8 = pnand %p1439_p12, %p2116_p7  ;;  %p1445_p10 = scmp.lt.s32.totalorder %s1986_s24, %s1443_s23 }
 0x1dd   : > { %p1441_p11 = pneg %p1440_p8 }
 0x1de   : > { %s1983_s30 = scalar_lea.hbm %s2117_s26, %s1900_s13  ;;  %s1444_s13 = scalar_lea.vmem %s1443_s23, 256 }
 0x1df   : > { %p1446_p5 = scmp.lt.s32.totalorder %s1444_s13, %s1438_s25 }
 0x1e1   : > { %p1447_p9 = por %p1446_p5, %p1445_p10 }
 0x1e3   : > { %p1448_p2 = pnand %p1447_p9, %p1441_p11 }
 0x1e5   : > { %1451 = shalt.err (!%p1448_p2)
}
 0x1e6   : > { %s1452_s6 = scalar_lea.hbm %s1983_s30, 128  ;;  %s1456_s15 = scalar_lea.hbm %s2117_s26, 256 }
 0x1e7   : > { %p1453_p4 = scmp.ne.s32.totalorder %s1983_s30, %s1452_s6  ;;  %p1457_p13 = scmp.lt.u32.totalorder %s1983_s30, %s2117_s26 }
 0x1e8   : > { %p1458_p6 = scmp.lt.u32.totalorder %s1456_s15, %s1452_s6  ;;  %p1460_p12 = scmp.lt.u32.totalorder %s1452_s6, %s1983_s30 }
 0x1e9   : > { %p1454_p3 = pnand %p1453_p4, %p2116_p7 }
 0x1ea   : > { %p1459_p0 = por %p1458_p6, %p1457_p13 }
 0x1eb   : > { %p1455_p1 = pneg %p1454_p3 }
 0x1ec   : > { %p1461_p8 = por %p1460_p12, %p1459_p0 }
 0x1ee   : > { %p1462_p11 = pnand %p1461_p8, %p1455_p1 }
 0x1f0   : > { %1465 = shalt.err (!%p1462_p11)
}
 0x1f1   : > { %1110 = dma.vmem_to_hbm [thread:$0]  (%p2116_p7), %s1986_s24, 128, %s1983_s30, %s1930_s7  }
 0x1f2 PF: > { %s2118_s3 = sld [smem:[#allocation23_spill]]  ;;  %s2119_s10 = sld [smem:[#allocation26_spill]] }
 0x1f3   : > { %s2120_s22 = sld [smem:[#allocation25_spill]] }
 0x1f8   : > { %s785_s27 = sand.u32 1, %s2118_s3   ;;  %p2121_p10 = scmp.ne.s32.totalorder %s2119_s10, 0 }
 0x1f9   : > { %p2122_p5 = scmp.ge.s32.totalorder %s2120_s22, 2  ;;  %s786_s11 = scalar_lea.sflag [#allocation4], %s785_s27 }
 0x1fb   : > { %p1135_p9 = pnand %p2122_p5, %p2121_p10 }
 0x1fd   : > { %1507 = dma.done.wait (!%p1135_p9), %s786_s11, 128  }
 0x1fe   : > { %1509 = vsyncadd (!%p1135_p9), %s786_s11, 4294967168  ;;  %s2123_s14 = sadd.s32 4294967294, %s2120_s22  }
 0x1ff   : > { %s794_s18 = sand.u32 1, %s2123_s14  }
 0x200   : > { %s795_s9 = scalar_lea.sflag [#allocation15], %s794_s18 }
 0x201   : > { %1511 = dma.done.wait (!%p1135_p9), %s795_s9, 256  }
 0x202   : > { %1513 = vsyncadd (!%p1135_p9), %s795_s9, 4294967040  ;;  %s33_s10 = sadd.s32 1, %s2120_s22   ;;  %s2124_s20 = sld [smem:[#allocation29_spill]] }
 0x203   : > { %p30_p7 = scmp.ge.s32.totalorder %s33_s10, 4   ;;  %s2125_s30 = sld [smem:[#allocation24_spill]] }
 0x204   : > { %s2126_s9 = sld [smem:[#allocation27_spill]]  ;;  %s2127_s27 = smov %s1520_s28 }
 0x205   : > { %s2128_s28 = smov %s1524_s29  ;;  %32 = sbr.rel (!%p30_p7) target bundleno = 18 (0x12), region = 157 }
 0x208   : > { %s2129_s29 = smov %s2124_s20 }
 0x20c   :  { %809 = vsyncpa [#allocation3], 1 }
 0x20d   :  { %811 = vsyncpa [#allocation3 + $0x1], 1 }
 0x20e   :  { %812 = vsyncpa [#allocation6], 1 }
 0x20f   :  { %814 = vsyncpa [#allocation6 + $0x1], 1 }
 0x210   :  { %815 = vsyncpa [#allocation9], 1 }
 0x211   :  { %816 = vsyncpa [#allocation12], 1 }
 0x212   :  { %817 = vsyncpa [#allocation4], 1 }
 0x213   :  { %819 = vsyncpa [#allocation4 + $0x1], 1 }
 0x214   :  { %820 = vsyncpa [#allocation15], 1 }
 0x215   :  { %822 = vsyncpa [#allocation15 + $0x1], 1 }

</bundles_post_ra>
